<compile_context>
chip_gen: v6e
topology: v6e:2x2x1
jax: 0.10.0
libtpu: 0.0.40
codegen_flags: <defaults>
</compile_context>

<pallas_src>
import jax
import jax.numpy as jnp
from jax import lax
from jax.experimental import pallas as pl
from jax.experimental.pallas import tpu as pltpu


def _dqsn_kernel(input_size, output_size, T, tau):
    """Returns a Pallas kernel closed over static I, O, T (timesteps), tau."""
    I = int(input_size)
    O = int(output_size)
    inv_tau = 1.0 / float(tau)
    decay = 1.0 - inv_tau                 # (1 - 1/tau), Python constant
    bias_scale = 1.0 - decay ** T         # sum_t decay^(T-t) * inv_tau / inv_tau

    def kernel(x_ref, p_ref, out_ref):
        x = x_ref[...]                               # (B, I)  f32
        # Static sublane slices of the single packed parameter slab (free views).
        w1 = p_ref[0:I, :]                           # (I, H)
        b1 = p_ref[I:I + 1, :]                       # (1, H)
        w2t = p_ref[I + 1:I + 1 + O, :]              # (O, H)  == w2^T
        b2 = p_ref[I + 1 + O:I + 2 + O, 0:O]         # (1, O)

        # Input current to the IF layer is identical every timestep -> hoisted.
        h = jnp.dot(x, w1, preferred_element_type=jnp.float32) + b1   # (B, H)

        # Hoist splat constants out of the unrolled loop (no CSE of broadcasts).
        zeros = jnp.zeros_like(h)
        ones = jnp.ones_like(h)
        decay_v = jnp.full_like(h, decay)

        def step(_, carry):
            v1, acc = carry
            # IFNode: charge, fire, hard-reset (mask-based, hoisted splats).
            v1 = v1 + h
            fire = v1 >= ones                        # v_th = 1.0
            # acc_T = sum_t decay^(T-1-t) * s_t  (recurrence acc = decay*acc + s)
            acc = decay_v * acc + jnp.where(fire, ones, zeros)
            v1 = jnp.where(fire, zeros, v1)
            return (v1, acc)

        _, acc = lax.fori_loop(0, T, step, (zeros, zeros), unroll=True)

        # Single readout matmul after the loop (linearity of NonSpikingLIF):
        #   v2_T = (1/tau) * acc @ W2 + b2 * (1 - decay^T)
        # w2 is stored transposed -> contract last dims directly (no transpose op).
        y = lax.dot_general(acc, w2t,
                            dimension_numbers=(((1,), (1,)), ((), ())),
                            preferred_element_type=jnp.float32)        # (B, O)
        out_ref[...] = inv_tau * y + bias_scale * b2

    return kernel


def pack_dqsn_params(w1, b1, w2, b2):
    """Pack w1 (I,H), b1 (1,H), w2 (H,O), b2 (1,O) into one (I+O+2, H) slab."""
    I, H = w1.shape
    O = w2.shape[1]
    b2_row = jnp.zeros((1, H), jnp.float32).at[:, :O].set(b2)
    return jnp.concatenate(
        [w1.astype(jnp.float32), b1.astype(jnp.float32),
         w2.T.astype(jnp.float32), b2_row], axis=0)


def dqsn_forward(x, params, *, input_size, output_size, T=16, tau=2.0):
    """x: (B, input_size); params: packed (input_size+output_size+2, H)."""
    B = x.shape[0]
    H = params.shape[1]
    O = output_size
    vmem = pl.BlockSpec(memory_space=pltpu.MemorySpace.VMEM)
    # Tiny advisory estimate so XLA doesn't over-schedule around the call.
    flops = 2 * B * H * (input_size + O) + 4 * T * B * H
    bytes_accessed = 4 * (x.size + params.size + B * O)
    return pl.pallas_call(
        _dqsn_kernel(input_size, output_size, T, tau),
        out_shape=jax.ShapeDtypeStruct((B, O), jnp.float32),
        in_specs=[vmem, vmem],
        out_specs=vmem,
        cost_estimate=pl.CostEstimate(flops=flops, transcendentals=0,
                                      bytes_accessed=bytes_accessed),
    )(x, params)


def dqsn_reference(x, w1, b1, w2, b2, *, T=16, tau=2.0):
    """Pure-JAX reference with step-by-step semantics (for correctness check)."""
    h = x @ w1 + b1
    v1 = jnp.zeros_like(h)
    v2 = jnp.zeros((x.shape[0], w2.shape[1]), jnp.float32)
    for _ in range(T):
        v1 = v1 + h
        s = (v1 >= 1.0).astype(jnp.float32)
        v1 = v1 * (1.0 - s)
        y = s @ w2 + b2
        v2 = v2 + (y - v2) / tau
    return v2


if __name__ == "__main__":
    # Small shapes consistent with the module (CartPole-style DQN):
    # batch=2, input_size=4, hidden_size=32, output_size=2, T=16
    B, I, H, O, T = 2, 4, 32, 2, 16

    key = jax.random.PRNGKey(0)
    kx, k1, kb1, k2, kb2 = jax.random.split(key, 5)

    # Deterministic synthetic parameters (uniform, PyTorch-Linear-like scale).
    x = jax.random.uniform(kx, (B, I), jnp.float32, minval=-1.0, maxval=1.0)
    lim1 = 1.0 / jnp.sqrt(I)
    w1 = jax.random.uniform(k1, (I, H), jnp.float32, minval=-lim1, maxval=lim1)
    b1 = jax.random.uniform(kb1, (1, H), jnp.float32, minval=-lim1, maxval=lim1)
    lim2 = 1.0 / jnp.sqrt(H)
    w2 = jax.random.uniform(k2, (H, O), jnp.float32, minval=-lim2, maxval=lim2)
    b2 = jax.random.uniform(kb2, (1, O), jnp.float32, minval=-lim2, maxval=lim2)

    # Pack parameters once into a single (8, 32) slab -> 2 input DMAs total.
    params = pack_dqsn_params(w1, b1, w2, b2)

    out = dqsn_forward(x, params, input_size=I, output_size=O, T=T, tau=2.0)
    out = jax.block_until_ready(out)

    ref = dqsn_reference(x, w1, b1, w2, b2, T=T, tau=2.0)
    assert out.shape == (B, O)
    # The hoisted readout changes summation order -> ULP-level differences only.
    assert jnp.allclose(out, ref, atol=1e-5, rtol=1e-5), (out, ref)

    print("KERNEL_OK")
</pallas_src>

<mosaic_0001>
module attributes {stable_mosaic.version = 11 : i64} {
  func.func @kernel(%arg0: memref<2x4xf32, #tpu.memory_space<vmem>>, %arg1: memref<8x32xf32, #tpu.memory_space<vmem>>, %arg2: memref<2x2xf32, #tpu.memory_space<vmem>>) attributes {dimension_semantics = [], scalar_prefetch = 0 : i64, scratch_operands = 0 : i64, tpu.core_type = #tpu.core_type<tc>} {
    %c0 = arith.constant 0 : index
    %c0_0 = arith.constant 0 : index
    %0 = vector.load %arg0[%c0, %c0_0] : memref<2x4xf32, #tpu.memory_space<vmem>>, vector<2x4xf32>
    %c0_1 = arith.constant 0 : index
    %c0_2 = arith.constant 0 : index
    %1 = vector.load %arg1[%c0_1, %c0_2] : memref<8x32xf32, #tpu.memory_space<vmem>>, vector<4x32xf32>
    %c4 = arith.constant 4 : index
    %c0_3 = arith.constant 0 : index
    %2 = vector.load %arg1[%c4, %c0_3] : memref<8x32xf32, #tpu.memory_space<vmem>>, vector<1x32xf32>
    %c5 = arith.constant 5 : index
    %c0_4 = arith.constant 0 : index
    %3 = vector.load %arg1[%c5, %c0_4] : memref<8x32xf32, #tpu.memory_space<vmem>>, vector<2x32xf32>
    %c7 = arith.constant 7 : index
    %c0_5 = arith.constant 0 : index
    %4 = vector.load %arg1[%c7, %c0_5] : memref<8x32xf32, #tpu.memory_space<vmem>>, vector<1x2xf32>
    %cst = arith.constant dense<0.000000e+00> : vector<2x32xf32>
    %5 = tpu.matmul %0, %1, %cst {dimension_numbers = #tpu.dot_dimension_numbers<[1], [0], [0], [1], [0, 0, 1, 1], [], []>} : vector<2x4xf32>, vector<4x32xf32>, vector<2x32xf32> -> vector<2x32xf32>
    %6 = vector.broadcast %2 : vector<1x32xf32> to vector<2x32xf32>
    %7 = arith.addf %5, %6 : vector<2x32xf32>
    %cst_6 = arith.constant 0.000000e+00 : f32
    %8 = vector.broadcast %cst_6 : f32 to vector<2x32xf32>
    %cst_7 = arith.constant 1.000000e+00 : f32
    %9 = vector.broadcast %cst_7 : f32 to vector<2x32xf32>
    %cst_8 = arith.constant 5.000000e-01 : f32
    %10 = vector.broadcast %cst_8 : f32 to vector<2x32xf32>
    %c0_i32 = arith.constant 0 : i32
    %11 = arith.addf %8, %7 : vector<2x32xf32>
    %12 = arith.cmpf oge, %11, %9 : vector<2x32xf32>
    %13 = arith.mulf %10, %8 : vector<2x32xf32>
    %14 = arith.select %12, %9, %8 : vector<2x32xi1>, vector<2x32xf32>
    %15 = arith.addf %13, %14 : vector<2x32xf32>
    %16 = arith.select %12, %8, %11 : vector<2x32xi1>, vector<2x32xf32>
    %c1_i32 = arith.constant 1 : i32
    %17 = arith.addf %16, %7 : vector<2x32xf32>
    %18 = arith.cmpf oge, %17, %9 : vector<2x32xf32>
    %19 = arith.mulf %10, %15 : vector<2x32xf32>
    %20 = arith.select %18, %9, %8 : vector<2x32xi1>, vector<2x32xf32>
    %21 = arith.addf %19, %20 : vector<2x32xf32>
    %22 = arith.select %18, %8, %17 : vector<2x32xi1>, vector<2x32xf32>
    %c2_i32 = arith.constant 2 : i32
    %23 = arith.addf %22, %7 : vector<2x32xf32>
    %24 = arith.cmpf oge, %23, %9 : vector<2x32xf32>
    %25 = arith.mulf %10, %21 : vector<2x32xf32>
    %26 = arith.select %24, %9, %8 : vector<2x32xi1>, vector<2x32xf32>
    %27 = arith.addf %25, %26 : vector<2x32xf32>
    %28 = arith.select %24, %8, %23 : vector<2x32xi1>, vector<2x32xf32>
    %c3_i32 = arith.constant 3 : i32
    %29 = arith.addf %28, %7 : vector<2x32xf32>
    %30 = arith.cmpf oge, %29, %9 : vector<2x32xf32>
    %31 = arith.mulf %10, %27 : vector<2x32xf32>
    %32 = arith.select %30, %9, %8 : vector<2x32xi1>, vector<2x32xf32>
    %33 = arith.addf %31, %32 : vector<2x32xf32>
    %34 = arith.select %30, %8, %29 : vector<2x32xi1>, vector<2x32xf32>
    %c4_i32 = arith.constant 4 : i32
    %35 = arith.addf %34, %7 : vector<2x32xf32>
    %36 = arith.cmpf oge, %35, %9 : vector<2x32xf32>
    %37 = arith.mulf %10, %33 : vector<2x32xf32>
    %38 = arith.select %36, %9, %8 : vector<2x32xi1>, vector<2x32xf32>
    %39 = arith.addf %37, %38 : vector<2x32xf32>
    %40 = arith.select %36, %8, %35 : vector<2x32xi1>, vector<2x32xf32>
    %c5_i32 = arith.constant 5 : i32
    %41 = arith.addf %40, %7 : vector<2x32xf32>
    %42 = arith.cmpf oge, %41, %9 : vector<2x32xf32>
    %43 = arith.mulf %10, %39 : vector<2x32xf32>
    %44 = arith.select %42, %9, %8 : vector<2x32xi1>, vector<2x32xf32>
    %45 = arith.addf %43, %44 : vector<2x32xf32>
    %46 = arith.select %42, %8, %41 : vector<2x32xi1>, vector<2x32xf32>
    %c6_i32 = arith.constant 6 : i32
    %47 = arith.addf %46, %7 : vector<2x32xf32>
    %48 = arith.cmpf oge, %47, %9 : vector<2x32xf32>
    %49 = arith.mulf %10, %45 : vector<2x32xf32>
    %50 = arith.select %48, %9, %8 : vector<2x32xi1>, vector<2x32xf32>
    %51 = arith.addf %49, %50 : vector<2x32xf32>
    %52 = arith.select %48, %8, %47 : vector<2x32xi1>, vector<2x32xf32>
    %c7_i32 = arith.constant 7 : i32
    %53 = arith.addf %52, %7 : vector<2x32xf32>
    %54 = arith.cmpf oge, %53, %9 : vector<2x32xf32>
    %55 = arith.mulf %10, %51 : vector<2x32xf32>
    %56 = arith.select %54, %9, %8 : vector<2x32xi1>, vector<2x32xf32>
    %57 = arith.addf %55, %56 : vector<2x32xf32>
    %58 = arith.select %54, %8, %53 : vector<2x32xi1>, vector<2x32xf32>
    %c8_i32 = arith.constant 8 : i32
    %59 = arith.addf %58, %7 : vector<2x32xf32>
    %60 = arith.cmpf oge, %59, %9 : vector<2x32xf32>
    %61 = arith.mulf %10, %57 : vector<2x32xf32>
    %62 = arith.select %60, %9, %8 : vector<2x32xi1>, vector<2x32xf32>
    %63 = arith.addf %61, %62 : vector<2x32xf32>
    %64 = arith.select %60, %8, %59 : vector<2x32xi1>, vector<2x32xf32>
    %c9_i32 = arith.constant 9 : i32
    %65 = arith.addf %64, %7 : vector<2x32xf32>
    %66 = arith.cmpf oge, %65, %9 : vector<2x32xf32>
    %67 = arith.mulf %10, %63 : vector<2x32xf32>
    %68 = arith.select %66, %9, %8 : vector<2x32xi1>, vector<2x32xf32>
    %69 = arith.addf %67, %68 : vector<2x32xf32>
    %70 = arith.select %66, %8, %65 : vector<2x32xi1>, vector<2x32xf32>
    %c10_i32 = arith.constant 10 : i32
    %71 = arith.addf %70, %7 : vector<2x32xf32>
    %72 = arith.cmpf oge, %71, %9 : vector<2x32xf32>
    %73 = arith.mulf %10, %69 : vector<2x32xf32>
    %74 = arith.select %72, %9, %8 : vector<2x32xi1>, vector<2x32xf32>
    %75 = arith.addf %73, %74 : vector<2x32xf32>
    %76 = arith.select %72, %8, %71 : vector<2x32xi1>, vector<2x32xf32>
    %c11_i32 = arith.constant 11 : i32
    %77 = arith.addf %76, %7 : vector<2x32xf32>
    %78 = arith.cmpf oge, %77, %9 : vector<2x32xf32>
    %79 = arith.mulf %10, %75 : vector<2x32xf32>
    %80 = arith.select %78, %9, %8 : vector<2x32xi1>, vector<2x32xf32>
    %81 = arith.addf %79, %80 : vector<2x32xf32>
    %82 = arith.select %78, %8, %77 : vector<2x32xi1>, vector<2x32xf32>
    %c12_i32 = arith.constant 12 : i32
    %83 = arith.addf %82, %7 : vector<2x32xf32>
    %84 = arith.cmpf oge, %83, %9 : vector<2x32xf32>
    %85 = arith.mulf %10, %81 : vector<2x32xf32>
    %86 = arith.select %84, %9, %8 : vector<2x32xi1>, vector<2x32xf32>
    %87 = arith.addf %85, %86 : vector<2x32xf32>
    %88 = arith.select %84, %8, %83 : vector<2x32xi1>, vector<2x32xf32>
    %c13_i32 = arith.constant 13 : i32
    %89 = arith.addf %88, %7 : vector<2x32xf32>
    %90 = arith.cmpf oge, %89, %9 : vector<2x32xf32>
    %91 = arith.mulf %10, %87 : vector<2x32xf32>
    %92 = arith.select %90, %9, %8 : vector<2x32xi1>, vector<2x32xf32>
    %93 = arith.addf %91, %92 : vector<2x32xf32>
    %94 = arith.select %90, %8, %89 : vector<2x32xi1>, vector<2x32xf32>
    %c14_i32 = arith.constant 14 : i32
    %95 = arith.addf %94, %7 : vector<2x32xf32>
    %96 = arith.cmpf oge, %95, %9 : vector<2x32xf32>
    %97 = arith.mulf %10, %93 : vector<2x32xf32>
    %98 = arith.select %96, %9, %8 : vector<2x32xi1>, vector<2x32xf32>
    %99 = arith.addf %97, %98 : vector<2x32xf32>
    %100 = arith.select %96, %8, %95 : vector<2x32xi1>, vector<2x32xf32>
    %c15_i32 = arith.constant 15 : i32
    %101 = arith.addf %100, %7 : vector<2x32xf32>
    %102 = arith.cmpf oge, %101, %9 : vector<2x32xf32>
    %103 = arith.mulf %10, %99 : vector<2x32xf32>
    %104 = arith.select %102, %9, %8 : vector<2x32xi1>, vector<2x32xf32>
    %105 = arith.addf %103, %104 : vector<2x32xf32>
    %106 = arith.select %102, %8, %101 : vector<2x32xi1>, vector<2x32xf32>
    %cst_9 = arith.constant dense<0.000000e+00> : vector<2x2xf32>
    %107 = tpu.matmul %105, %3, %cst_9 {dimension_numbers = #tpu.dot_dimension_numbers<[1], [1], [0], [0], [0, 0, 1, 0], [], []>} : vector<2x32xf32>, vector<2x32xf32>, vector<2x2xf32> -> vector<2x2xf32>
    %cst_10 = arith.constant 5.000000e-01 : f32
    %108 = vector.broadcast %cst_10 : f32 to vector<2x2xf32>
    %109 = arith.mulf %108, %107 : vector<2x2xf32>
    %cst_11 = arith.constant 0.999984741 : f32
    %110 = vector.broadcast %cst_11 : f32 to vector<1x2xf32>
    %111 = arith.mulf %110, %4 : vector<1x2xf32>
    %112 = vector.broadcast %111 : vector<1x2xf32> to vector<2x2xf32>
    %113 = arith.addf %109, %112 : vector<2x2xf32>
    %c0_12 = arith.constant 0 : index
    %c0_13 = arith.constant 0 : index
    %114 = vector.load %arg2[%c0_12, %c0_13] : memref<2x2xf32, #tpu.memory_space<vmem>>, vector<2x2xf32>
    tpu.vector_store %arg2[%c0_12, %c0_13], %113 {strides = array<i32>} : memref<2x2xf32, #tpu.memory_space<vmem>>, vector<2x2xf32>,
    return
  }
}

</mosaic_0001>

<bundles_post_ra>
// kernel: tpu_custom_call.1
= control target key start
LH: loop header
LB: loop body
LE: loop exit
PB: predicated region body
PF: predicated region fallthrough
CT: control target
= control target key end

     0   :  { %7 = vsyncpa [#allocation3], 0  ;;  %s479_s0 = inlined_call_operand.hbm [shape: f32[2,4], index: 0, kind: input, shape index: {}]   ;;  %s480_s1 = inlined_call_operand.hbm [shape: f32[8,32], index: 1, kind: input, shape index: {}]   ;;  %s481_s2 = inlined_call_operand.hbm [shape: f32[2,2], index: 2, kind: output, shape index: {}]  }
   0x1   :  { %8 = vsyncpa [#allocation6], 0 }
   0x2   :  { %9 = vsyncpa [#allocation4], 0  ;;  %s409_s9 = smov [#allocation2]   ;;  %s410_s11 = smov [#allocation5]  }
   0x3   :  { %s16_s10 = sshll.u32 %s409_s9, 4  ;;  %s26_s12 = sshll.u32 %s410_s11, 4  ;;  %s17_s10 = int_to_ptr.vmem [resolvable:$true] %s16_s10  ;;  %s27_s12 = int_to_ptr.vmem [resolvable:$true] %s26_s12 }
   0x4   :  { %s351_s13 = scalar_lea.vmem %s17_s10, 32  ;;  %p356_p1 = scmp.lt.s32.totalorder %s17_s10, %s17_s10 }
   0x5   :  { %p352_p0 = scmp.ne.s32.totalorder %s17_s10, %s351_s13  ;;  %p357_p2 = scmp.lt.s32.totalorder %s351_s13, %s351_s13 }
   0x7   :  { %p358_p3 = por %p357_p2, %p356_p1 }
   0x9   :  { %p359_p4 = pnand %p358_p3, %p352_p0 }
   0xb   :  { %362 = shalt.err (!%p359_p4)
}
   0xc   :  { %19 = dma.hbm_to_vmem [thread:$0]  %s479_s0, 32, %s17_s10, [#allocation3]  }
   0xd   :  { %s371_s16 = scalar_lea.vmem %s27_s12, 128  ;;  %p376_p6 = scmp.lt.s32.totalorder %s27_s12, %s27_s12 }
   0xe   :  { %p372_p5 = scmp.ne.s32.totalorder %s27_s12, %s371_s16  ;;  %p377_p7 = scmp.lt.s32.totalorder %s371_s16, %s371_s16 }
  0x10   :  { %p378_p8 = por %p377_p7, %p376_p6 }
  0x12   :  { %p379_p9 = pnand %p378_p8, %p372_p5 }
  0x14   :  { %382 = shalt.err (!%p379_p9)
}
  0x15   :  { %29 = dma.hbm_to_vmem [thread:$0]  %s480_s1, 128, %s27_s12, [#allocation6]  }
  0x16   :  { %403 = dma.done.wait [#allocation3], 32  }
  0x17   :  { %404 = vsyncadd [#allocation3], 4294967264 }
  0x18   :  { %405 = dma.done.wait [#allocation6], 128  }
  0x19   :  { %406 = vsyncadd [#allocation6], 4294967168  ;;  %v411_v0 = vmov 0.0   ;;  %vm412_vm0 = vmmov 0   ;;  %vm49_vm1 = vcmask 1043456   ;;  %vm45_vm2 = vcmask 31744  }
  0x1a   :  { %328 = vmatprep.subr.mxu0 %v411_v0  ;;  %330 = vmatprep.mubr.msk.f32.mxu0 %vm412_vm0, %v411_v0  ;;  %v37_v1 = vld [vmem:[#allocation5] sm:$0xf]  ;;  %v36_v2 = vld [vmem:[#allocation2] sm:$0x3]  ;;  %v39_v3 = vld [vmem:[#allocation5 + $0x5] sm:$0x3] }
  0x1b   :  { %333 = vmatprep.subr.mxu1 %v411_v0  ;;  %335 = vmatprep.mubr.msk.f32.mxu1 %vm412_vm0, %v411_v0  ;;  %vm217_vm3 = vcmask 261120   ;;  %v319_v4 = vld [vmem:[#allocation5 + $0x4] ss:$0 sm:$0xff]  ;;  %s413_s0 = smov [#allocation7]  }
  0x1c   :  { %329 = vmatpush3.msk.msra.mxu0 %vm49_vm1, %v37_v1  ;;  %334 = vmatpush3.xpose.msk.msra.mxu1 %vm217_vm3, %v39_v3  ;;  %s309_s1 = sshll.u32 %s413_s0, 4  ;;  %s310_s1 = int_to_ptr.vmem [resolvable:$true] %s309_s1 }
  0x1d   :  { %331 = vmatmul.mubr.msk.f32.vlgmr.msra.gmra.mxu0 %vm45_vm2, %v36_v2  ;;  %s383_s19 = scalar_lea.vmem %s310_s1, 32  ;;  %p388_p11 = scmp.lt.s32.totalorder %s310_s1, %s310_s1 }
  0x1e   :  { %p384_p10 = scmp.ne.s32.totalorder %s310_s1, %s383_s19  ;;  %p389_p12 = scmp.lt.s32.totalorder %s383_s19, %s383_s19 }
  0x20   :  { %p390_p13 = por %p389_p12, %p388_p11 }
  0x22   :  { %p391_p0 = pnand %p390_p13, %p384_p10 }
  0xdd   :  { %v119_v5 = vpop.f32.mrf.mxu0 }
  0xde   :  { %v440_v6 = vadd.f32 %v319_v4, %v119_v5 }
  0xdf   :  { %v332_v7 = vpop.f32.mrf.mxu0 }
  0xe0   :  { %vm124_vm4 = vcmp.ge.f32.partialorder %v440_v6, 1.0 }
  0xe1   :  { %v125_v8 = vsel %vm124_vm4, 1.0, %v411_v0  ;;  %v127_v9 = vsel %vm124_vm4, 0.0, %v440_v6 }
  0xe2   :  { %v128_v10 = vadd.f32 %v127_v9, %v440_v6  ;;  %v130_v11 = vmul.f32 0.5, %v125_v8 }
  0xe4   :  { %vm129_vm5 = vcmp.ge.f32.partialorder %v128_v10, 1.0 }
  0xe5   :  { %v131_v12 = vsel %vm129_vm5, 1.0, %v411_v0  ;;  %v133_v13 = vsel %vm129_vm5, 0.0, %v128_v10  ;;  %vm301_vm5 = vcmask 9216  }
  0xe6   :  { %v132_v14 = vadd.f32 %v131_v12, %v130_v11  ;;  %v134_v15 = vadd.f32 %v133_v13, %v440_v6 }
  0xe8   :  { %vm135_vm6 = vcmp.ge.f32.partialorder %v134_v15, 1.0  ;;  %v136_v16 = vmul.f32 0.5, %v132_v14 }
  0xe9   :  { %v137_v17 = vsel %vm135_vm6, 1.0, %v411_v0  ;;  %v139_v18 = vsel %vm135_vm6, 0.0, %v134_v15 }
  0xea   :  { %v138_v19 = vadd.f32 %v137_v17, %v136_v16  ;;  %v140_v20 = vadd.f32 %v139_v18, %v440_v6 }
  0xec   :  { %vm141_vm7 = vcmp.ge.f32.partialorder %v140_v20, 1.0  ;;  %v142_v21 = vmul.f32 0.5, %v138_v19 }
  0xed   :  { %v143_v22 = vsel %vm141_vm7, 1.0, %v411_v0  ;;  %v145_v23 = vsel %vm141_vm7, 0.0, %v140_v20 }
  0xee   :  { %v144_v24 = vadd.f32 %v143_v22, %v142_v21  ;;  %v146_v25 = vadd.f32 %v145_v23, %v440_v6  ;;  %v296_v22 = vlaneseq }
  0xf0   :  { %vm147_vm8 = vcmp.ge.f32.partialorder %v146_v25, 1.0  ;;  %v148_v26 = vmul.f32 0.5, %v144_v24  ;;  %v297_v23 = vshrl.u32 %v296_v22, 7  ;;  %v40_v24 = vld [vmem:[#allocation5 + $0x7] sm:$0x1] }
  0xf1   :  { %v149_v27 = vsel %vm147_vm8, 1.0, %v411_v0  ;;  %v151_v28 = vsel %vm147_vm8, 0.0, %v146_v25  ;;  %v295_v25 = vmul.f32 0.99998474, %v40_v24 }
  0xf2   :  { %v150_v29 = vadd.f32 %v149_v27, %v148_v26  ;;  %v152_v30 = vadd.f32 %v151_v28, %v440_v6  ;;  %v298_v26 = vsub.s32 0, %v297_v23 }
  0xf4   :  { %vm153_vm9 = vcmp.ge.f32.partialorder %v152_v30, 1.0  ;;  %v154_v31 = vmul.f32 0.5, %v150_v29  ;;  %v299_v27 = vrot.slane %v295_v25, %v298_v26 }
  0xf5   :  { %v155_v32 = vsel %vm153_vm9, 1.0, %v411_v0  ;;  %v157_v33 = vsel %vm153_vm9, 0.0, %v152_v30 }
  0xf6   :  { %v156_v34 = vadd.f32 %v155_v32, %v154_v31  ;;  %v158_v35 = vadd.f32 %v157_v33, %v440_v6 }
  0xf8   :  { %vm159_vm10 = vcmp.ge.f32.partialorder %v158_v35, 1.0  ;;  %v160_v36 = vmul.f32 0.5, %v156_v34 }
  0xf9   :  { %v161_v37 = vsel %vm159_vm10, 1.0, %v411_v0  ;;  %v163_v38 = vsel %vm159_vm10, 0.0, %v158_v35 }
  0xfa   :  { %v162_v39 = vadd.f32 %v161_v37, %v160_v36  ;;  %v164_v40 = vadd.f32 %v163_v38, %v440_v6 }
  0xfc   :  { %vm165_vm11 = vcmp.ge.f32.partialorder %v164_v40, 1.0  ;;  %v166_v41 = vmul.f32 0.5, %v162_v39 }
  0xfd   :  { %v167_v42 = vsel %vm165_vm11, 1.0, %v411_v0  ;;  %v169_v43 = vsel %vm165_vm11, 0.0, %v164_v40 }
  0xfe   :  { %v168_v44 = vadd.f32 %v167_v42, %v166_v41  ;;  %v170_v45 = vadd.f32 %v169_v43, %v440_v6 }
 0x100   :  { %vm171_vm12 = vcmp.ge.f32.partialorder %v170_v45, 1.0  ;;  %v172_v46 = vmul.f32 0.5, %v168_v44 }
 0x101   :  { %v173_v47 = vsel %vm171_vm12, 1.0, %v411_v0  ;;  %v175_v48 = vsel %vm171_vm12, 0.0, %v170_v45 }
 0x102   :  { %v174_v49 = vadd.f32 %v173_v47, %v172_v46  ;;  %v176_v50 = vadd.f32 %v175_v48, %v440_v6 }
 0x104   :  { %vm177_vm13 = vcmp.ge.f32.partialorder %v176_v50, 1.0  ;;  %v178_v51 = vmul.f32 0.5, %v174_v49 }
 0x105   :  { %v179_v52 = vsel %vm177_vm13, 1.0, %v411_v0  ;;  %v181_v53 = vsel %vm177_vm13, 0.0, %v176_v50 }
 0x106   :  { %v180_v54 = vadd.f32 %v179_v52, %v178_v51  ;;  %v182_v55 = vadd.f32 %v181_v53, %v440_v6 }
 0x108   :  { %vm183_vm14 = vcmp.ge.f32.partialorder %v182_v55, 1.0  ;;  %v184_v56 = vmul.f32 0.5, %v180_v54 }
 0x109   :  { %v185_v57 = vsel %vm183_vm14, 1.0, %v411_v0  ;;  %v187_v58 = vsel %vm183_vm14, 0.0, %v182_v55 }
 0x10a   :  { %v186_v59 = vadd.f32 %v185_v57, %v184_v56  ;;  %v188_v60 = vadd.f32 %v187_v58, %v440_v6 }
 0x10c   :  { %vm189_vm15 = vcmp.ge.f32.partialorder %v188_v60, 1.0  ;;  %v190_v61 = vmul.f32 0.5, %v186_v59 }
 0x10d   :  { %v191_v62 = vsel %vm189_vm15, 1.0, %v411_v0  ;;  %v193_v63 = vsel %vm189_vm15, 0.0, %v188_v60 }
 0x10e   :  { %v192_v1 = vadd.f32 %v191_v62, %v190_v61  ;;  %v194_v2 = vadd.f32 %v193_v63, %v440_v6 }
 0x110   :  { %vm195_vm0 = vcmp.ge.f32.partialorder %v194_v2, 1.0  ;;  %v196_v3 = vmul.f32 0.5, %v192_v1 }
 0x111   :  { %v197_v4 = vsel %vm195_vm0, 1.0, %v411_v0  ;;  %v199_v5 = vsel %vm195_vm0, 0.0, %v194_v2 }
 0x112   :  { %v198_v7 = vadd.f32 %v197_v4, %v196_v3  ;;  %v200_v8 = vadd.f32 %v199_v5, %v440_v6 }
 0x114   :  { %vm201_vm1 = vcmp.ge.f32.partialorder %v200_v8, 1.0  ;;  %v202_v9 = vmul.f32 0.5, %v198_v7 }
 0x115   :  { %v203_v10 = vsel %vm201_vm1, 1.0, %v411_v0  ;;  %v205_v11 = vsel %vm201_vm1, 0.0, %v200_v8 }
 0x116   :  { %v204_v12 = vadd.f32 %v203_v10, %v202_v9  ;;  %v206_v13 = vadd.f32 %v205_v11, %v440_v6 }
 0x118   :  { %vm207_vm2 = vcmp.ge.f32.partialorder %v206_v13, 1.0  ;;  %v208_v14 = vmul.f32 0.5, %v204_v12 }
 0x119   :  { %v209_v15 = vsel %vm207_vm2, 1.0, %v411_v0  ;;  %v211_v16 = vsel %vm207_vm2, 0.0, %v206_v13 }
 0x11a   :  { %v210_v17 = vadd.f32 %v209_v15, %v208_v14  ;;  %v212_v18 = vadd.f32 %v211_v16, %v440_v6 }
 0x11c   :  { %vm213_vm4 = vcmp.ge.f32.partialorder %v212_v18, 1.0  ;;  %v214_v19 = vmul.f32 0.5, %v210_v17 }
 0x11d   :  { %v215_v20 = vsel %vm213_vm4, 1.0, %v411_v0 }
 0x11e   :  { %v216_v21 = vadd.f32 %v215_v20, %v214_v19 }
 0x120   :  { %336 = vmatmul.mubr.msk.f32.vlgmr.msra.gmra.mxu1 %vm217_vm3, %v216_v21 }
 0x1e0   :  { %v290_v28 = vpop.f32.mrf.mxu1 }
 0x1e1   :  { %v294_v29 = vmul.f32 0.5, %v290_v28 }
 0x1e2   :  { %v337_v30 = vpop.f32.mrf.mxu1 }
 0x1e3   :  { %v300_v6 = vadd.f32 %v299_v27, %v294_v29 }
 0x1e5   :  { %302 = vst.msk [vmem:[#allocation7] sm:$0x3] %vm301_vm5, %v300_v6 }
 0x1e6   :  { %394 = shalt.err (!%p391_p0)
}
 0x1e7   :  { %312 = dma.vmem_to_hbm [thread:$0]  %s310_s1, 32, %s481_s2, [#allocation4]  }
 0x1e8   :  { %407 = dma.done.wait [#allocation4], 32  }
 0x1e9   :  { %408 = vsyncadd [#allocation4], 4294967264 }
 0x1ea   :  { %316 = vsyncpa [#allocation3], 1 }
 0x1eb   :  { %317 = vsyncpa [#allocation6], 1 }
 0x1ec   :  { %318 = vsyncpa [#allocation4], 1 }

</bundles_post_ra>
